<compile_context>
chip_gen: v7x
topology: tpu7x:2x2x1
jax: 0.10.0
libtpu: 0.0.40
codegen_flags: <defaults>
</compile_context>

<pallas_src>
import math
from functools import partial

import jax
import jax.numpy as jnp
from jax.experimental import pallas as pl
from jax.experimental.pallas import tpu as pltpu

HIDDEN = 256  # fc1 / noisy1 width from the PyTorch module


def _round_up(n, m):
    return ((n + m - 1) // m) * m


def _cdiv(a, b):
    return (a + b - 1) // b


def _choose_batch_tile(B):
    """Pick (tile_rows, num_tiles) for the batch axis.

    Constraints / goals (perf review):
      * tile is a multiple of 16 (bf16 sublane packing -> no relayout),
      * tile <= 1024 (weights are VMEM-resident, x/out tiles stay ~MBs),
      * >= 2 grid steps when B >= 32 so v7x's 2nd TensorCore gets work,
      * minimal batch padding (e.g. B=300 -> tile 160 / pad 320, not 512).
    """
    CAP = 1024
    B16 = _round_up(max(B, 1), 16)
    if B16 <= 16:
        return 16, 1
    n_min = 2 if B16 >= 32 else 1
    n = max(n_min, _cdiv(B16, CAP))
    tile = _round_up(_cdiv(B16, n), 16)
    n = _cdiv(B16, tile)  # re-derive so the last tile is never all padding
    return tile, n


def dueling_dqn_kernel(x_ref, w1_ref, b1_ref, w2_ref, b2_ref, wh_ref, bh_ref,
                       q_ref):
    # x: (Bt, Dp) compute dtype; weights compute dtype; biases f32;
    # q: (Bt, Ap).  All matmuls accumulate in f32 on the MXU; the bias-add /
    # ReLU epilogue stays f32 (v5e has no bf16 VPU).
    cd = w2_ref.dtype

    # fc1 + ReLU
    h1 = jnp.dot(x_ref[...], w1_ref[...],
                 preferred_element_type=jnp.float32) + b1_ref[...]
    h1 = jnp.maximum(h1, 0.0)

    # noisy1 (effective training-mode weights) + ReLU
    h2 = jnp.dot(h1.astype(cd), w2_ref[...],
                 preferred_element_type=jnp.float32) + b2_ref[...]
    h2 = jnp.maximum(h2, 0.0)

    # fused dueling head: q = h2 @ W_head + b_head
    q = jnp.dot(h2.astype(cd), wh_ref[...],
                preferred_element_type=jnp.float32) + bh_ref[...]
    q_ref[...] = q.astype(q_ref.dtype)


def prepare_params(params, *, compute_dtype=jnp.bfloat16):
    """One-time parameter preparation, hoisted off the per-call hot path.

    Folds the dueling head (in f32, then one bf16 quantization), pads to
    lane-dense shapes (D -> mult of 128, actions -> 128), casts matmul
    weights to the compute dtype.  Returns a tuple of device arrays that can
    be cached and reused across forward calls.
    """
    w1, b1, w2, b2, wv, bv, wa, ba = params
    D = w1.shape[0]
    A = wa.shape[1]
    D_pad = _round_up(D, 128)   # only to 128 — don't pad further (wastes MXU)
    A_pad = _round_up(A, 128)   # lane-dense output stores

    # Exact algebraic fold of the dueling head (done in f32):
    #   q = V + Adv - mean(Adv)
    #     = h2 @ (wv + wa - mean_cols(wa)) + (bv + ba - mean(ba))
    w_head = wv + wa - jnp.mean(wa, axis=1, keepdims=True)
    b_head = bv + ba - jnp.mean(ba, axis=1, keepdims=True)

    w1_p = jnp.pad(w1, ((0, D_pad - D), (0, 0))).astype(compute_dtype)
    w2_c = w2.astype(compute_dtype)
    wh_p = jnp.pad(w_head, ((0, 0), (0, A_pad - A))).astype(compute_dtype)
    b1_f = b1.astype(jnp.float32)
    b2_f = b2.astype(jnp.float32)
    bh_p = jnp.pad(b_head.astype(jnp.float32), ((0, 0), (0, A_pad - A)))
    return (w1_p, b1_f, w2_c, b2_f, wh_p, bh_p)


@partial(jax.jit, static_argnames=("n_actions", "out_dtype"))
def dueling_dqn_forward(x, prepared, *, n_actions, out_dtype=jnp.float32):
    """x: (B, C, H) float32.  Returns q: (B, n_actions) float32."""
    w1_p, b1_f, w2_c, b2_f, wh_p, bh_p = prepared
    cd = w1_p.dtype

    B = x.shape[0]
    x_flat = x.reshape(B, -1)            # matches torch x.view(B, -1)
    D = x_flat.shape[1]
    D_pad = w1_p.shape[0]
    A_pad = wh_p.shape[1]
    A = n_actions

    Bt, n_tiles = _choose_batch_tile(B)
    B_pad = Bt * n_tiles

    # Single fused cast+pad pass over x.  The explicit zero K-padding is
    # load-bearing: padded w1 rows are zero, so padded x columns must be
    # finite zeros (never rely on OOB block reads here).
    x_p = jnp.pad(x_flat.astype(cd), ((0, B_pad - B), (0, D_pad - D)))

    flops = 2 * B_pad * (D_pad * HIDDEN + HIDDEN * HIDDEN + HIDDEN * A_pad)
    bytes_accessed = (
        x_p.size * jnp.dtype(cd).itemsize
        + B_pad * A_pad * jnp.dtype(out_dtype).itemsize
        + (w1_p.size + w2_c.size + wh_p.size) * jnp.dtype(cd).itemsize
        + (b1_f.size + b2_f.size + bh_p.size) * 4)

    q_pad = pl.pallas_call(
        dueling_dqn_kernel,
        out_shape=jax.ShapeDtypeStruct((B_pad, A_pad), out_dtype),
        grid=(n_tiles,),
        in_specs=[
            pl.BlockSpec((Bt, D_pad), lambda i: (i, 0)),      # x: tiled over batch
            pl.BlockSpec((D_pad, HIDDEN), lambda i: (0, 0)),  # weights: VMEM-resident
            pl.BlockSpec((1, HIDDEN), lambda i: (0, 0)),
            pl.BlockSpec((HIDDEN, HIDDEN), lambda i: (0, 0)),
            pl.BlockSpec((1, HIDDEN), lambda i: (0, 0)),
            pl.BlockSpec((HIDDEN, A_pad), lambda i: (0, 0)),
            pl.BlockSpec((1, A_pad), lambda i: (0, 0)),
        ],
        out_specs=pl.BlockSpec((Bt, A_pad), lambda i: (i, 0)),
        compiler_params=pltpu.CompilerParams(
            dimension_semantics=("parallel",),  # >=2 tiles feed both TCs on v7x
        ),
        cost_estimate=pl.CostEstimate(
            flops=flops, transcendentals=0, bytes_accessed=bytes_accessed),
    )(x_p, w1_p, b1_f, w2_c, b2_f, wh_p, bh_p)

    return q_pad[:B, :A].astype(jnp.float32)


def init_params(key, in_dim, n_actions, sigma_init=0.017):
    """Deterministic parameter init mirroring the PyTorch module's __init__.

    Returns effective (training-mode) weights stored as (in, out) and biases
    as (1, out), all float32.  NoisyLinear in training mode uses
    W = weight_mu + weight_sigma * weight_eps (same for bias).
    """
    keys = jax.random.split(key, 12)

    def uniform(k, shape, bound):
        return jax.random.uniform(k, shape, jnp.float32, -bound, bound)

    # fc1: nn.Linear(in_dim, 256)
    b = 1.0 / math.sqrt(in_dim)
    w1 = uniform(keys[0], (in_dim, HIDDEN), b)
    b1 = uniform(keys[1], (1, HIDDEN), b)

    def noisy(kw, kb, kwe, kbe, fan_in, fan_out):
        mu_range = 1.0 / math.sqrt(fan_in)
        w_mu = uniform(kw, (fan_in, fan_out), mu_range)
        b_mu = uniform(kb, (1, fan_out), mu_range)
        w_eps = jax.random.normal(kwe, (fan_in, fan_out), jnp.float32)
        b_eps = jax.random.normal(kbe, (1, fan_out), jnp.float32)
        return w_mu + sigma_init * w_eps, b_mu + sigma_init * b_eps

    w2, b2 = noisy(keys[2], keys[3], keys[4], keys[5], HIDDEN, HIDDEN)   # noisy1
    wv, bv = noisy(keys[6], keys[7], keys[8], keys[9], HIDDEN, 1)        # val
    wa, ba = noisy(keys[10], keys[11],
                   jax.random.fold_in(keys[10], 1),
                   jax.random.fold_in(keys[11], 1), HIDDEN, n_actions)   # adv

    return (w1, b1, w2, b2, wv, bv, wa, ba)


if __name__ == "__main__":
    key = jax.random.PRNGKey(0)
    k_x, k_p = jax.random.split(key)

    # obs_shape = (C, H) = (4, 16) -> flattened input dim 64; n_actions = 8
    B, C, H = 2, 4, 16
    n_actions = 8

    x = jax.random.normal(k_x, (B, C, H), jnp.float32)
    params = init_params(k_p, C * H, n_actions)

    # One-time prep (fold / pad / cast), cached and reused across calls.
    prepared = prepare_params(params)
    jax.block_until_ready(prepared)

    q = dueling_dqn_forward(x, prepared, n_actions=n_actions)
    jax.block_until_ready(q)
    assert q.shape == (B, n_actions) and q.dtype == jnp.float32

    # Reference check in plain JAX, original op order, full f32 (kernel uses
    # bf16 matmul operands with f32 accumulation -> loose tolerance).
    (w1, b1, w2, b2, wv, bv, wa, ba) = params
    xf = x.reshape(B, -1)
    h1 = jnp.maximum(xf @ w1 + b1, 0.0)
    h2 = jnp.maximum(h1 @ w2 + b2, 0.0)
    val = h2 @ wv + bv
    adv = h2 @ wa + ba
    q_ref = val + adv - adv.mean(axis=1, keepdims=True)
    assert jnp.allclose(q, q_ref, atol=5e-2, rtol=5e-2), float(
        jnp.max(jnp.abs(q - q_ref)))

    print("KERNEL_OK")
</pallas_src>

<mosaic_0001>
module attributes {stable_mosaic.version = 11 : i64} {
  func.func @dueling_dqn_kernel(%arg0: i32, %arg1: memref<16x128xbf16, #tpu.memory_space<vmem>>, %arg2: memref<128x256xbf16, #tpu.memory_space<vmem>>, %arg3: memref<1x256xf32, #tpu.memory_space<vmem>>, %arg4: memref<256x256xbf16, #tpu.memory_space<vmem>>, %arg5: memref<1x256xf32, #tpu.memory_space<vmem>>, %arg6: memref<256x128xbf16, #tpu.memory_space<vmem>>, %arg7: memref<1x128xf32, #tpu.memory_space<vmem>>, %arg8: memref<16x128xf32, #tpu.memory_space<vmem>>) attributes {dimension_semantics = [#tpu.dimension_semantics<parallel>], iteration_bounds = array<i64: 1>, scalar_prefetch = 0 : i64, scratch_operands = 0 : i64, tpu.core_type = #tpu.core_type<tc>, window_params = [{transform_indices = @transform_0, window_bounds = array<i64: 16, 128>}, {pipeline_mode = #tpu.pipeline_mode<synchronous>, transform_indices = @transform_1, window_bounds = array<i64: 128, 256>}, {pipeline_mode = #tpu.pipeline_mode<synchronous>, transform_indices = @transform_2, window_bounds = array<i64: 1, 256>}, {pipeline_mode = #tpu.pipeline_mode<synchronous>, transform_indices = @transform_3, window_bounds = array<i64: 256, 256>}, {pipeline_mode = #tpu.pipeline_mode<synchronous>, transform_indices = @transform_4, window_bounds = array<i64: 1, 256>}, {pipeline_mode = #tpu.pipeline_mode<synchronous>, transform_indices = @transform_5, window_bounds = array<i64: 256, 128>}, {pipeline_mode = #tpu.pipeline_mode<synchronous>, transform_indices = @transform_6, window_bounds = array<i64: 1, 128>}, {transform_indices = @transform_7, window_bounds = array<i64: 16, 128>}]} {
    %c0 = arith.constant 0 : index
    %c0_0 = arith.constant 0 : index
    %0 = vector.load %arg1[%c0, %c0_0] : memref<16x128xbf16, #tpu.memory_space<vmem>>, vector<16x128xbf16>
    %c0_1 = arith.constant 0 : index
    %c0_2 = arith.constant 0 : index
    %1 = vector.load %arg2[%c0_1, %c0_2] : memref<128x256xbf16, #tpu.memory_space<vmem>>, vector<128x256xbf16>
    %cst = arith.constant dense<0.000000e+00> : vector<16x256xf32>
    %2 = tpu.matmul %0, %1, %cst {dimension_numbers = #tpu.dot_dimension_numbers<[1], [0], [0], [1], [0, 0, 1, 1], [], []>} : vector<16x128xbf16>, vector<128x256xbf16>, vector<16x256xf32> -> vector<16x256xf32>
    %c0_3 = arith.constant 0 : index
    %c0_4 = arith.constant 0 : index
    %3 = vector.load %arg3[%c0_3, %c0_4] : memref<1x256xf32, #tpu.memory_space<vmem>>, vector<1x256xf32>
    %4 = vector.broadcast %3 : vector<1x256xf32> to vector<16x256xf32>
    %5 = arith.addf %2, %4 : vector<16x256xf32>
    %cst_5 = arith.constant 0.000000e+00 : f32
    %6 = vector.broadcast %cst_5 : f32 to vector<16x256xf32>
    %7 = arith.maximumf %5, %6 : vector<16x256xf32>
    %8 = arith.truncf %7 : vector<16x256xf32> to vector<16x256xbf16>
    %c0_6 = arith.constant 0 : index
    %c0_7 = arith.constant 0 : index
    %9 = vector.load %arg4[%c0_6, %c0_7] : memref<256x256xbf16, #tpu.memory_space<vmem>>, vector<256x256xbf16>
    %cst_8 = arith.constant dense<0.000000e+00> : vector<16x256xf32>
    %10 = tpu.matmul %8, %9, %cst_8 {dimension_numbers = #tpu.dot_dimension_numbers<[1], [0], [0], [1], [0, 0, 1, 1], [], []>} : vector<16x256xbf16>, vector<256x256xbf16>, vector<16x256xf32> -> vector<16x256xf32>
    %c0_9 = arith.constant 0 : index
    %c0_10 = arith.constant 0 : index
    %11 = vector.load %arg5[%c0_9, %c0_10] : memref<1x256xf32, #tpu.memory_space<vmem>>, vector<1x256xf32>
    %12 = vector.broadcast %11 : vector<1x256xf32> to vector<16x256xf32>
    %13 = arith.addf %10, %12 : vector<16x256xf32>
    %cst_11 = arith.constant 0.000000e+00 : f32
    %14 = vector.broadcast %cst_11 : f32 to vector<16x256xf32>
    %15 = arith.maximumf %13, %14 : vector<16x256xf32>
    %16 = arith.truncf %15 : vector<16x256xf32> to vector<16x256xbf16>
    %c0_12 = arith.constant 0 : index
    %c0_13 = arith.constant 0 : index
    %17 = vector.load %arg6[%c0_12, %c0_13] : memref<256x128xbf16, #tpu.memory_space<vmem>>, vector<256x128xbf16>
    %cst_14 = arith.constant dense<0.000000e+00> : vector<16x128xf32>
    %18 = tpu.matmul %16, %17, %cst_14 {dimension_numbers = #tpu.dot_dimension_numbers<[1], [0], [0], [1], [0, 0, 1, 1], [], []>} : vector<16x256xbf16>, vector<256x128xbf16>, vector<16x128xf32> -> vector<16x128xf32>
    %c0_15 = arith.constant 0 : index
    %c0_16 = arith.constant 0 : index
    %19 = vector.load %arg7[%c0_15, %c0_16] : memref<1x128xf32, #tpu.memory_space<vmem>>, vector<1x128xf32>
    %20 = vector.broadcast %19 : vector<1x128xf32> to vector<16x128xf32>
    %21 = arith.addf %18, %20 : vector<16x128xf32>
    %c0_17 = arith.constant 0 : index
    %c0_18 = arith.constant 0 : index
    %22 = vector.load %arg8[%c0_17, %c0_18] : memref<16x128xf32, #tpu.memory_space<vmem>>, vector<16x128xf32>
    tpu.vector_store %arg8[%c0_17, %c0_18], %21 {strides = array<i32>} : memref<16x128xf32, #tpu.memory_space<vmem>>, vector<16x128xf32>,
    return
  }
  func.func @transform_0(%arg0: i32) -> (i32, i32) {
    %c0_i32 = arith.constant 0 : i32
    %c0_i32_0 = arith.constant 0 : i32
    return %arg0, %c0_i32 : i32, i32
  }
  func.func @transform_1(%arg0: i32) -> (i32, i32) {
    %c0_i32 = arith.constant 0 : i32
    %c0_i32_0 = arith.constant 0 : i32
    %c0_i32_1 = arith.constant 0 : i32
    return %c0_i32, %c0_i32_0 : i32, i32
  }
  func.func @transform_2(%arg0: i32) -> (i32, i32) {
    %c0_i32 = arith.constant 0 : i32
    %c0_i32_0 = arith.constant 0 : i32
    %c0_i32_1 = arith.constant 0 : i32
    return %c0_i32, %c0_i32_0 : i32, i32
  }
  func.func @transform_3(%arg0: i32) -> (i32, i32) {
    %c0_i32 = arith.constant 0 : i32
    %c0_i32_0 = arith.constant 0 : i32
    %c0_i32_1 = arith.constant 0 : i32
    return %c0_i32, %c0_i32_0 : i32, i32
  }
  func.func @transform_4(%arg0: i32) -> (i32, i32) {
    %c0_i32 = arith.constant 0 : i32
    %c0_i32_0 = arith.constant 0 : i32
    %c0_i32_1 = arith.constant 0 : i32
    return %c0_i32, %c0_i32_0 : i32, i32
  }
  func.func @transform_5(%arg0: i32) -> (i32, i32) {
    %c0_i32 = arith.constant 0 : i32
    %c0_i32_0 = arith.constant 0 : i32
    %c0_i32_1 = arith.constant 0 : i32
    return %c0_i32, %c0_i32_0 : i32, i32
  }
  func.func @transform_6(%arg0: i32) -> (i32, i32) {
    %c0_i32 = arith.constant 0 : i32
    %c0_i32_0 = arith.constant 0 : i32
    %c0_i32_1 = arith.constant 0 : i32
    return %c0_i32, %c0_i32_0 : i32, i32
  }
  func.func @transform_7(%arg0: i32) -> (i32, i32) {
    %c0_i32 = arith.constant 0 : i32
    %c0_i32_0 = arith.constant 0 : i32
    return %arg0, %c0_i32 : i32, i32
  }
}

</mosaic_0001>

<bundles_post_ra>
// kernel: dueling_dqn_forward.1
= control target key start
LH: loop header
LB: loop body
LE: loop exit
PB: predicated region body
PF: predicated region fallthrough
CT: control target
= control target key end

     0   :  { %12 = vsyncpa [#allocation3], 0  ;;  %s1034_s0 = inlined_call_operand.vmem [shape: bf16[16,128], index: 0, kind: input, shape index: {}]   ;;  %s1035_s1 = inlined_call_operand.hbm [shape: bf16[128,256], index: 1, kind: input, shape index: {}]   ;;  %s1036_s2 = inlined_call_operand.vmem [shape: f32[1,256], index: 2, kind: input, shape index: {}]   ;;  %s1037_s3 = inlined_call_operand.hbm [shape: bf16[256,256], index: 3, kind: input, shape index: {}]   ;;  %s1038_s4 = inlined_call_operand.vmem [shape: f32[1,256], index: 4, kind: input, shape index: {}]   ;;  %s1039_s5 = inlined_call_operand.hbm [shape: bf16[256,128], index: 5, kind: input, shape index: {}]   ;;  %s1040_s6 = inlined_call_operand.vmem [shape: f32[1,128], index: 6, kind: input, shape index: {}]   ;;  %s1041_s7 = inlined_call_operand.vmem [shape: f32[16,128], index: 7, kind: output, shape index: {}]  }
   0x1   :  { %13 = vsyncpa [#allocation5], 0  ;;  %s925_s24 = smov [#allocation4]   ;;  %s926_s26 = smov [#allocation2]  }
   0x2   :  { %s35_s25 = sshll.u32 %s925_s24, 4  ;;  %s21_s27 = sshll.u32 %s926_s26, 4  ;;  %s36_s25 = int_to_ptr.vmem [resolvable:$true] %s35_s25  ;;  %s973_s27 = int_to_ptr.vmem [resolvable:$true] %s21_s27 }
   0x3   :  { %s855_s30 = scalar_lea.hbm %s1037_s3, 4096 }
   0x4   :  { %p856_p0 = scmp.ne.s32.totalorder %s1037_s3, %s855_s30  ;;  %p859_p1 = scmp.lt.u32.totalorder %s855_s30, %s1037_s3 }
   0x6   :  { %p861_p2 = pnand %p859_p1, %p856_p0 }
   0x8   :  { %864 = shalt.err (!%p861_p2)
}
   0x9   :  { %s865_s12 = scalar_lea.vmem %s36_s25, 4096  ;;  %p870_p4 = scmp.lt.s32.totalorder %s36_s25, %s36_s25 }
   0xa   :  { %p866_p3 = scmp.ne.s32.totalorder %s36_s25, %s865_s12  ;;  %p871_p5 = scmp.lt.s32.totalorder %s865_s12, %s865_s12 }
   0xc   :  { %p872_p6 = por %p871_p5, %p870_p4 }
   0xe   :  { %p873_p7 = pnand %p872_p6, %p866_p3 }
  0x10   :  { %876 = shalt.err (!%p873_p7)
}
  0x11   :  { %s927_s13 = smov 128   ;;  %s928_s14 = smov 8  }
  0x12   :  { %41 = dma.hbm_to_vmem [thread:$0]  %s1037_s3, 4096, %s36_s25, [#allocation5], %s927_s13, %s927_s13, %s928_s14  }
  0x13   :  { %s877_s19 = scalar_lea.hbm %s1035_s1, 2048 }
  0x14   :  { %p878_p8 = scmp.ne.s32.totalorder %s1035_s1, %s877_s19  ;;  %p881_p9 = scmp.lt.u32.totalorder %s877_s19, %s1035_s1 }
  0x16   :  { %p883_p10 = pnand %p881_p9, %p878_p8 }
  0x18   :  { %886 = shalt.err (!%p883_p10)
}
  0x19   :  { %s887_s24 = scalar_lea.vmem %s973_s27, 2048  ;;  %p892_p12 = scmp.lt.s32.totalorder %s973_s27, %s973_s27 }
  0x1a   :  { %p888_p11 = scmp.ne.s32.totalorder %s973_s27, %s887_s24  ;;  %p893_p13 = scmp.lt.s32.totalorder %s887_s24, %s887_s24 }
  0x1c   :  { %p894_p0 = por %p893_p13, %p892_p12 }
  0x1e   :  { %p895_p1 = pnand %p894_p0, %p888_p11 }
  0x20   :  { %898 = shalt.err (!%p895_p1)
}
  0x21   :  { %27 = dma.hbm_to_vmem [thread:$0]  %s1035_s1, 2048, %s973_s27, [#allocation3], %s927_s13, %s927_s13, %s928_s14  }
  0x22   :  { %s929_s26 = smov [#allocation6]   ;;  %s899_s8 = scalar_lea.hbm %s1039_s5, 2048 }
  0x23   :  { %s49_s28 = sshll.u32 %s929_s26, 4  ;;  %p900_p2 = scmp.ne.s32.totalorder %s1039_s5, %s899_s8  ;;  %s50_s28 = int_to_ptr.vmem [resolvable:$true] %s49_s28 }
  0x24   :  { %p903_p3 = scmp.lt.u32.totalorder %s899_s8, %s1039_s5 }
  0x26   :  { %p905_p4 = pnand %p903_p3, %p900_p2 }
  0x28   :  { %908 = shalt.err (!%p905_p4)
}
  0x29   :  { %s909_s15 = scalar_lea.vmem %s50_s28, 2048  ;;  %p914_p6 = scmp.lt.s32.totalorder %s50_s28, %s50_s28 }
  0x2a   :  { %p910_p5 = scmp.ne.s32.totalorder %s50_s28, %s909_s15  ;;  %p915_p7 = scmp.lt.s32.totalorder %s909_s15, %s909_s15 }
  0x2c   :  { %p916_p8 = por %p915_p7, %p914_p6 }
  0x2e   :  { %p917_p9 = pnand %p916_p8, %p910_p5 }
  0x30   :  { %920 = shalt.err (!%p917_p9)
}
  0x31   :  { %s930_s1 = smov 64   ;;  %s931_s27 = smov 4  }
  0x32   :  { %55 = dma.hbm_to_vmem [thread:$0]  %s1039_s5, 2048, %s50_s28, [#allocation5], %s930_s1, %s930_s1, %s931_s27  }
  0x33   :  { %921 = dma.done.wait [#allocation3], 2048  }
  0x34   :  { %922 = vsyncadd [#allocation3], 4294965248 }
  0x35   :  { %923 = dma.done.wait [#allocation5], 6144  }
  0x36   :  { %924 = vsyncadd [#allocation5], 4294961152  ;;  %v932_v0 = vmov 0   ;;  %v766_v1 = vld [vmem:[#allocation2 + $0x4] ss:$8 sps:$4 sm:$0xff]   ;;  %v843_v54 = vld [vmem:[#allocation6 + $0x50] sm:$0xff]   ;;  %v88_v61 = vlaneseq }
  0x37   :  { %216 = vmatprep.mubr.bf16.mxu0 %v932_v0  ;;  %v768_v2 = vld [vmem:[#allocation2] ss:$8 sps:$4 sm:$0xff]   ;;  %184 = vmatprep.subr.bf16.mxu0 %v766_v1  ;;  %v769_v3 = vld [vmem:[#allocation2 + $0x14] ss:$8 sps:$4 sm:$0xff]   ;;  %v771_v4 = vld [vmem:[#allocation2 + $0x10] ss:$8 sps:$4 sm:$0xff]  }
  0x38   :  { %185 = vmatpush1.bf16.msra.mxu0 %v768_v2  ;;  %v772_v5 = vld [vmem:[#allocation2 + $0x24] ss:$8 sps:$4 sm:$0xff]   ;;  %v774_v6 = vld [vmem:[#allocation2 + $0x20] ss:$8 sps:$4 sm:$0xff]   ;;  %v775_v7 = vld [vmem:[#allocation2 + $0x34] ss:$8 sps:$4 sm:$0xff]  }
  0x39   :  { %186 = vmatprep.subr.bf16.mxu0 %v769_v3  ;;  %v777_v8 = vld [vmem:[#allocation2 + $0x30] ss:$8 sps:$4 sm:$0xff]   ;;  %v778_v9 = vld [vmem:[#allocation2 + $0x44] ss:$8 sps:$4 sm:$0xff]   ;;  %v793_v11 = vld [vmem:[#allocation4] ss:$8 sps:$4 sm:$0xff]  }
  0x3a   :  { %v791_v10 = vld [vmem:[#allocation4 + $0x4] ss:$8 sps:$4 sm:$0xff]   ;;  %v794_v12 = vld [vmem:[#allocation4 + $0x14] ss:$8 sps:$4 sm:$0xff]   ;;  %v780_v13 = vld [vmem:[#allocation2 + $0x40] ss:$8 sps:$4 sm:$0xff]  }
  0x3b   :  { %437 = vmatprep.subr.bf16.mxu1 %v791_v10  ;;  %v796_v14 = vld [vmem:[#allocation4 + $0x10] ss:$8 sps:$4 sm:$0xff]   ;;  %v781_v15 = vld [vmem:[#allocation2 + $0x54] ss:$8 sps:$4 sm:$0xff]   ;;  %v797_v16 = vld [vmem:[#allocation4 + $0x24] ss:$8 sps:$4 sm:$0xff]  }
  0x3c   :  { %187 = vmatpush1.bf16.msra.mxu0 %v771_v4  ;;  %438 = vmatpush1.bf16.msra.mxu1 %v793_v11  ;;  %v783_v17 = vld [vmem:[#allocation2 + $0x50] ss:$8 sps:$4 sm:$0xff]   ;;  %v799_v18 = vld [vmem:[#allocation4 + $0x20] ss:$8 sps:$4 sm:$0xff]   ;;  %v784_v19 = vld [vmem:[#allocation2 + $0x64] ss:$8 sps:$4 sm:$0xff]  }
  0x3d   :  { %188 = vmatprep.subr.bf16.mxu0 %v772_v5  ;;  %439 = vmatprep.subr.bf16.mxu1 %v794_v12  ;;  %v800_v20 = vld [vmem:[#allocation4 + $0x34] ss:$8 sps:$4 sm:$0xff]   ;;  %v786_v21 = vld [vmem:[#allocation2 + $0x60] ss:$8 sps:$4 sm:$0xff]   ;;  %v802_v22 = vld [vmem:[#allocation4 + $0x30] ss:$8 sps:$4 sm:$0xff]  }
  0x3e   :  { %v787_v23 = vld [vmem:[#allocation2 + $0x74] ss:$8 sps:$4 sm:$0xff]   ;;  %v803_v24 = vld [vmem:[#allocation4 + $0x44] ss:$8 sps:$4 sm:$0xff]   ;;  %v789_v25 = vld [vmem:[#allocation2 + $0x70] ss:$8 sps:$4 sm:$0xff]  }
  0x3f   :  { %v805_v26 = vld [vmem:[#allocation4 + $0x40] ss:$8 sps:$4 sm:$0xff]   ;;  %v806_v28 = vld [vmem:[#allocation4 + $0x54] ss:$8 sps:$4 sm:$0xff]   ;;  %v808_v29 = vld [vmem:[#allocation4 + $0x50] ss:$8 sps:$4 sm:$0xff]  }
  0x40   :  { %189 = vmatpush1.bf16.msra.mxu0 %v774_v6  ;;  %440 = vmatpush1.bf16.msra.mxu1 %v796_v14  ;;  %v790_v27 = vld [vmem:[%s1034_s0] sm:$0xff]   ;;  %v812_v32 = vld [vmem:[#allocation4 + $0x74] ss:$8 sps:$4 sm:$0xff]   ;;  %v814_v33 = vld [vmem:[#allocation4 + $0x70] ss:$8 sps:$4 sm:$0xff]   ;;  %v89_v62 = vshrl.u32 %v88_v61, 7 }
  0x41   :  { %190 = vmatprep.subr.bf16.mxu0 %v775_v7  ;;  %441 = vmatprep.subr.bf16.mxu1 %v797_v16  ;;  %v809_v30 = vld [vmem:[#allocation4 + $0x64] ss:$8 sps:$4 sm:$0xff]   ;;  %v811_v31 = vld [vmem:[#allocation4 + $0x60] ss:$8 sps:$4 sm:$0xff]   ;;  %v818_v36 = vld [vmem:[#allocation4 + $0x94] ss:$8 sps:$4 sm:$0xff]  }
  0x42   :  { %v815_v34 = vld [vmem:[#allocation4 + $0x84] ss:$8 sps:$4 sm:$0xff]   ;;  %v817_v35 = vld [vmem:[#allocation4 + $0x80] ss:$8 sps:$4 sm:$0xff]   ;;  %v820_v37 = vld [vmem:[#allocation4 + $0x90] ss:$8 sps:$4 sm:$0xff]  }
  0x43   :  { %v821_v38 = vld [vmem:[#allocation4 + $0xa4] ss:$8 sps:$4 sm:$0xff]   ;;  %v823_v39 = vld [vmem:[#allocation4 + $0xa0] ss:$8 sps:$4 sm:$0xff]   ;;  %v824_v40 = vld [vmem:[#allocation4 + $0xb4] ss:$8 sps:$4 sm:$0xff]  }
  0x44   :  { %191 = vmatpush1.bf16.msra.mxu0 %v777_v8  ;;  %442 = vmatpush1.bf16.msra.mxu1 %v799_v18  ;;  %v826_v41 = vld [vmem:[#allocation4 + $0xb0] ss:$8 sps:$4 sm:$0xff]   ;;  %v827_v42 = vld [vmem:[#allocation4 + $0xc4] ss:$8 sps:$4 sm:$0xff]   ;;  %v829_v43 = vld [vmem:[#allocation4 + $0xc0] ss:$8 sps:$4 sm:$0xff]  }
  0x45   :  { %192 = vmatprep.subr.bf16.mxu0 %v778_v9  ;;  %443 = vmatprep.subr.bf16.mxu1 %v800_v20  ;;  %v830_v44 = vld [vmem:[#allocation4 + $0xd4] ss:$8 sps:$4 sm:$0xff]   ;;  %v832_v45 = vld [vmem:[#allocation4 + $0xd0] ss:$8 sps:$4 sm:$0xff]   ;;  %v833_v46 = vld [vmem:[#allocation4 + $0xe4] ss:$8 sps:$4 sm:$0xff]  }
  0x46   :  { %v835_v47 = vld [vmem:[#allocation4 + $0xe0] ss:$8 sps:$4 sm:$0xff]   ;;  %v836_v48 = vld [vmem:[#allocation4 + $0xf4] ss:$8 sps:$4 sm:$0xff]   ;;  %v838_v49 = vld [vmem:[#allocation4 + $0xf0] ss:$8 sps:$4 sm:$0xff]  }
  0x47   :  { %v839_v50 = vld [vmem:[#allocation6 + $0x40] sm:$0xff]   ;;  %v841_v52 = vld [vmem:[#allocation6 + $0x48] sm:$0xff]   ;;  %v844_v55 = vld [vmem:[#allocation6 + $0x10] sm:$0xff]   ;;  %v90_v63 = vsub.s32 0, %v89_v62  ;;  %v94_v1 = vsub.s32 1, %v89_v62 }
  0x48   :  { %193 = vmatpush1.bf16.msra.mxu0 %v780_v13  ;;  %444 = vmatpush1.bf16.msra.mxu1 %v802_v22  ;;  %v840_v51 = vld [vmem:[#allocation6] sm:$0xff]   ;;  %v842_v53 = vld [vmem:[#allocation6 + $0x8] sm:$0xff]   ;;  %v845_v56 = vld [vmem:[#allocation6 + $0x58] sm:$0xff]  }
  0x49   :  { %194 = vmatprep.subr.bf16.mxu0 %v781_v15  ;;  %445 = vmatprep.subr.bf16.mxu1 %v803_v24  ;;  %v846_v57 = vld [vmem:[#allocation6 + $0x18] sm:$0xff]   ;;  %v847_v58 = vld [vmem:[#allocation6 + $0x60] sm:$0xff]   ;;  %v849_v60 = vld [vmem:[#allocation6 + $0x68] sm:$0xff]  }
  0x4a   :  { %v848_v59 = vld [vmem:[#allocation6 + $0x20] sm:$0xff]   ;;  %v850_v18 = vld [vmem:[#allocation6 + $0x28] sm:$0xff]   ;;  %v852_v20 = vld [vmem:[#allocation6 + $0x30] sm:$0xff]  }
  0x4b   :  { %v86_v0 = vld [vmem:[%s1036_s2] sm:$0x3]  ;;  %v854_v22 = vld [vmem:[#allocation6 + $0x38] sm:$0xff]  }
  0x4c   :  { %195 = vmatpush1.bf16.msra.mxu0 %v783_v17  ;;  %446 = vmatpush1.bf16.msra.mxu1 %v805_v26  ;;  %v91_v2 = vrot.slane %v86_v0, %v90_v63  ;;  %v95_v3 = vrot.slane %v86_v0, %v94_v1 }
  0x4d   :  { %196 = vmatprep.subr.bf16.mxu0 %v784_v19  ;;  %447 = vmatprep.subr.bf16.mxu1 %v806_v28  ;;  %v851_v19 = vld [vmem:[#allocation6 + $0x70] sm:$0xff]  }
  0x50   :  { %197 = vmatpush1.bf16.msra.mxu0 %v786_v21  ;;  %448 = vmatpush1.bf16.msra.mxu1 %v808_v29  ;;  %v853_v21 = vld [vmem:[#allocation6 + $0x78] sm:$0xff]  }
  0x51   :  { %198 = vmatprep.subr.bf16.mxu0 %v787_v23  ;;  %449 = vmatprep.subr.bf16.mxu1 %v809_v30  ;;  %v265_v23 = vld [vmem:[%s1038_s4] sm:$0x3] }
  0x52   :  { %v270_v24 = vrot.slane %v265_v23, %v90_v63 }
  0x54   :  { %199 = vmatpush1.bf16.msra.mxu0 %v789_v25  ;;  %450 = vmatpush1.bf16.msra.mxu1 %v811_v31  ;;  %v274_v25 = vrot.slane %v265_v23, %v94_v1 }
  0x55   :  { %451 = vmatprep.subr.bf16.mxu1 %v812_v32  ;;  %736 = vmatprep.subr.bf16.mxu0 %v839_v50 }
  0x57   :  { %217 = vmatmul.mubr.bf16.vlgmr.msra.gmra.mrb[0].mxu0 %v790_v27 }
  0x58   :  { %452 = vmatpush1.bf16.msra.mxu1 %v814_v33  ;;  %737 = vmatpush3.bf16.msra.mxu0 %v840_v51 }
  0x59   :  { %453 = vmatprep.subr.bf16.mxu1 %v815_v34  ;;  %738 = vmatprep.subr.bf16.mxu0 %v841_v52 }
  0x5c   :  { %454 = vmatpush1.bf16.msra.mxu1 %v817_v35  ;;  %739 = vmatpush3.bf16.msra.mxu0 %v842_v53 }
  0x5d   :  { %455 = vmatprep.subr.bf16.mxu1 %v818_v36  ;;  %740 = vmatprep.subr.bf16.mxu0 %v843_v54 }
  0x60   :  { %456 = vmatpush1.bf16.msra.mxu1 %v820_v37  ;;  %741 = vmatpush3.bf16.msra.mxu0 %v844_v55 }
  0x61   :  { %457 = vmatprep.subr.bf16.mxu1 %v821_v38  ;;  %742 = vmatprep.subr.bf16.mxu0 %v845_v56 }
  0x64   :  { %458 = vmatpush1.bf16.msra.mxu1 %v823_v39  ;;  %743 = vmatpush3.bf16.msra.mxu0 %v846_v57 }
  0x65   :  { %459 = vmatprep.subr.bf16.mxu1 %v824_v40  ;;  %744 = vmatprep.subr.bf16.mxu0 %v847_v58 }
  0x68   :  { %460 = vmatpush1.bf16.msra.mxu1 %v826_v41  ;;  %745 = vmatpush3.bf16.msra.mxu0 %v848_v59  ;;  %v719_v41 = vld [vmem:[%s1040_s6] ss:$0 sm:$0xff] }
  0x69   :  { %461 = vmatprep.subr.bf16.mxu1 %v827_v42  ;;  %746 = vmatprep.subr.bf16.mxu0 %v849_v60 }
  0x6c   :  { %462 = vmatpush1.bf16.msra.mxu1 %v829_v43  ;;  %747 = vmatpush3.bf16.msra.mxu0 %v850_v18 }
  0x6d   :  { %463 = vmatprep.subr.bf16.mxu1 %v830_v44  ;;  %748 = vmatprep.subr.bf16.mxu0 %v851_v19 }
  0x70   :  { %464 = vmatpush1.bf16.msra.mxu1 %v832_v45  ;;  %749 = vmatpush3.bf16.msra.mxu0 %v852_v20 }
  0x71   :  { %465 = vmatprep.subr.bf16.mxu1 %v833_v46  ;;  %750 = vmatprep.subr.bf16.mxu0 %v853_v21 }
  0x74   :  { %466 = vmatpush1.bf16.msra.mxu1 %v835_v47  ;;  %751 = vmatpush3.bf16.msra.mxu0 %v854_v22 }
  0x75   :  { %467 = vmatprep.subr.bf16.mxu1 %v836_v48 }
  0x78   :  { %468 = vmatpush1.bf16.msra.mxu1 %v838_v49 }
 0x12a   :  { %v218_v4 = vpop.f32.mrb[0].mxu0 }
 0x12b   :  { %v219_v5 = vadd.f32 %v218_v4, %v91_v2  ;;  %v220_v6 = vpop.f32.mrb[1].mxu0 }
 0x12c   :  { %v221_v7 = vadd.f32 %v220_v6, %v95_v3  ;;  %v222_v8 = vpop.f32.mrb[2].mxu0 }
 0x12d   :  { %v223_v9 = vadd.f32 %v222_v8, %v91_v2  ;;  %v224_v10 = vpop.f32.mrb[3].mxu0  ;;  %v227_v12 = vmax.f32 %v219_v5, 0.0 }
 0x12e   :  { %v225_v11 = vadd.f32 %v224_v10, %v95_v3  ;;  %v228_v14 = vmax.f32 %v221_v7, 0.0 }
 0x12f   :  { %v229_v13 = vmax.f32 %v223_v9, 0.0 }
 0x130   :  { %v230_v15 = vmax.f32 %v225_v11, 0.0 }
 0x131   :  { %v231_v16 = vpack.c.bf16 %v229_v13, %v227_v12 }
 0x132   :  { %v232_v17 = vpack.c.bf16 %v230_v15, %v228_v14 }
 0x134   :  { %469 = vmatprep.mubr.bf16.mxu1 %v232_v17 }
 0x135   :  { %470 = vmatmul.mubr.bf16.vlgmr.msra.gmra.mrb[0].mxu1 %v231_v16 }
 0x208   :  { %v471_v26 = vpop.f32.mrb[0].mxu1 }
 0x209   :  { %v472_v27 = vadd.f32 %v471_v26, %v270_v24  ;;  %v473_v28 = vpop.f32.mrb[1].mxu1 }
 0x20a   :  { %v474_v29 = vadd.f32 %v473_v28, %v274_v25  ;;  %v475_v30 = vpop.f32.mrb[2].mxu1 }
 0x20b   :  { %v476_v31 = vadd.f32 %v475_v30, %v270_v24  ;;  %v477_v32 = vpop.f32.mrb[3].mxu1  ;;  %v480_v34 = vmax.f32 %v472_v27, 0.0 }
 0x20c   :  { %v478_v33 = vadd.f32 %v477_v32, %v274_v25  ;;  %v481_v36 = vmax.f32 %v474_v29, 0.0 }
 0x20d   :  { %v482_v35 = vmax.f32 %v476_v31, 0.0 }
 0x20e   :  { %v483_v37 = vmax.f32 %v478_v33, 0.0 }
 0x20f   :  { %v484_v38 = vpack.c.bf16 %v482_v35, %v480_v34 }
 0x210   :  { %v485_v39 = vpack.c.bf16 %v483_v37, %v481_v36 }
 0x212   :  { %653 = vmatprep.mubr.bf16.mxu0 %v485_v39 }
 0x213   :  { %654 = vmatmul.mubr.bf16.vlgmr.msra.gmra.mrb[4].mxu0 %v484_v38 }
 0x2e6   :  { %v752_v40 = vpop.f32.mrb[4].mxu0 }
 0x2e7   :  { %v753_v42 = vpop.f32.mrb[5].mxu0 }
 0x2e8   :  { %v754_v43 = vadd.f32 %v753_v42, %v752_v40  ;;  %v755_v44 = vpop.f32.mrb[6].mxu0 }
 0x2e9   :  { %v756_v45 = vpop.f32.mrb[7].mxu0 }
 0x2ea   :  { %v656_v46 = vadd.f32 %v754_v43, %v719_v41  ;;  %v757_v47 = vadd.f32 %v756_v45, %v755_v44 }
 0x2ec   :  { %662 = vst [vmem:[%s1041_s7] sm:$0xff] %v656_v46  ;;  %v659_v48 = vadd.f32 %v757_v47, %v719_v41 }
 0x2ee   :  { %663 = vst [vmem:[%s1041_s7 + $0x8] sm:$0xff] %v659_v48 }
 0x2ef   :  { %668 = vsyncpa [#allocation3], 1 }
 0x2f0   :  { %669 = vsyncpa [#allocation5], 1 }

</bundles_post_ra>
